<compile_context>
chip_gen: v7x
topology: tpu7x:2x2x1
jax: 0.10.0
libtpu: 0.0.40
codegen_flags: <defaults>
</compile_context>

<pallas_src>
import functools

import numpy as np
import jax
import jax.numpy as jnp
from jax.experimental import pallas as pl
from jax.experimental.pallas import tpu as pltpu


def create_kernel(radius=1.0, circular=True, distance_weighted=True, hole=False,
                  method=3, sigma=2.0, normalised=False):
    """Deterministic re-implementation of the buteo `create_kernel` used in __init__."""
    size = int(np.ceil(radius)) * 2 + 1
    coords = np.arange(size, dtype=np.float64) - (size // 2)
    yy, xx = np.meshgrid(coords, coords, indexing="ij")
    dist = np.sqrt(xx ** 2 + yy ** 2)
    if distance_weighted and method == 3:
        k = np.exp(-(dist ** 2) / (2.0 * sigma ** 2))
    else:
        k = np.ones((size, size), dtype=np.float64)
    if circular:
        k = np.where(dist <= radius, k, 0.0)
    if hole:
        k[size // 2, size // 2] = 0.0
    if normalised and k.sum() > 0:
        k = k / k.sum()
    return k.astype(np.float32)


def _spatial_hot_kernel(codes_ref, out_ref, *, classes, tap_groups, n_slots,
                        center_weight, eps):
    # codes_ref: [1, S, TR, 128] int32 -- slot 0: center-pixel class codes,
    #            slots 1..: neighbor class codes (one per non-zero tap, group order).
    # out_ref:   [1, C, TR, 128] f32   -- soft labels in flat-pixel layout.
    center = codes_ref[0, 0]                                   # [TR, 128] int32
    nbrs = [codes_ref[0, s] for s in range(1, n_slots)]        # loaded once, reused per class
    cw = jnp.float32(center_weight)

    convs = []
    denom = None
    for cls_val in classes:                                    # class codes are constants
        c = jnp.int32(cls_val)
        acc = None
        idx = 0
        for w, count in tap_groups:                            # equal-weight taps -> one multiply
            gsum = None
            for _ in range(count):
                hot = (nbrs[idx] == c).astype(jnp.float32)
                gsum = hot if gsum is None else gsum + hot
                idx += 1
            term = jnp.float32(w) * gsum
            acc = term if acc is None else acc + term
        if acc is None:                                        # degenerate kernel (all taps zero)
            acc = jnp.zeros(center.shape, jnp.float32)
        # method == 'half': center pixel of its own class gets the fixed weight
        conv_c = jnp.where(center == c, cw, acc)
        convs.append(conv_c)
        denom = conv_c if denom is None else denom + conv_c

    inv = pl.reciprocal(jnp.maximum(denom, jnp.float32(eps)), approx=False)
    for ci, conv_c in enumerate(convs):
        out_ref[0, ci] = conv_c * inv


def spatial_hot(target, classes, *, method="half", kernel_radius=1.0,
                kernel_circular=True, kernel_sigma=2.0, epsilon=1e-07,
                max_rows_per_tile=256):
    """target: [H, W] or [B, H, W] integer class codes.
    Returns [C, H, W] (or [B, C, H, W]) f32 soft labels."""
    assert method == "half"  # TODO(synk): 'max' / 'kernel_half' / None branches not implemented
    kernel_np = create_kernel(radius=kernel_radius, circular=kernel_circular,
                              distance_weighted=True, hole=True, method=3,
                              sigma=kernel_sigma, normalised=False)
    ksz = kernel_np.size
    strength = ksz / (ksz - 1.0)
    pad = (kernel_np.shape[0] - 1) // 2
    center_weight = float(kernel_np.sum() * strength)

    squeeze = (target.ndim == 2)
    if squeeze:
        target = target[None]
    B, H, W = target.shape
    classes = [int(c) for c in classes]
    C = len(classes)

    # Group non-zero taps by (equal) weight; remember their window offsets.
    k = kernel_np.shape[0]
    groups = {}
    for u in range(k):
        for v in range(k):
            w = float(kernel_np[u, v])
            if w != 0.0:
                groups.setdefault(w, []).append((u, v))
    tap_groups = tuple((w, len(offs)) for w, offs in groups.items())
    offsets = [(pad, pad)]                      # slot 0 = center pixel
    for _, offs in groups.items():
        offsets.extend(offs)
    S = len(offsets)

    # Wrapper-side layout plumbing (free XLA work): replicate-pad, gather the
    # shifted neighbor views, flatten pixels, re-lay as [rows, 128].
    tgt = target.astype(jnp.int32)
    tpad = jnp.pad(tgt, ((0, 0), (pad, pad), (pad, pad)), mode="edge")
    maps = [tpad[:, u:u + H, v:v + W].reshape(B, H * W) for (u, v) in offsets]
    stack = jnp.stack(maps, axis=1)                             # [B, S, N] int32

    LANES = 128
    N = H * W
    nrows = -(-N // LANES)
    if nrows <= max_rows_per_tile:
        tile_r, nrows_pad = nrows, nrows
    else:
        tile_r = max_rows_per_tile
        nrows_pad = -(-nrows // tile_r) * tile_r
    n_pad = nrows_pad * LANES
    if n_pad != N:
        stack = jnp.pad(stack, ((0, 0), (0, 0), (0, n_pad - N)))
    stack = stack.reshape(B, S, nrows_pad, LANES)

    kern = functools.partial(_spatial_hot_kernel, classes=classes,
                             tap_groups=tap_groups, n_slots=S,
                             center_weight=center_weight, eps=float(epsilon))

    out = pl.pallas_call(
        kern,
        out_shape=jax.ShapeDtypeStruct((B, C, nrows_pad, LANES), jnp.float32),
        grid_spec=pltpu.PrefetchScalarGridSpec(
            num_scalar_prefetch=0,
            grid=(B, nrows_pad // tile_r),
            in_specs=[pl.BlockSpec((1, S, tile_r, LANES), lambda b, r: (b, 0, r, 0))],
            out_specs=pl.BlockSpec((1, C, tile_r, LANES), lambda b, r: (b, 0, r, 0)),
        ),
        compiler_params=pltpu.CompilerParams(
            dimension_semantics=("parallel", "parallel")),
    )(stack)

    out = out.reshape(B, C, n_pad)[:, :, :N].reshape(B, C, H, W)
    return out[0] if squeeze else out


def _reference(target, classes, epsilon=1e-07):
    """Pure-JAX reference mirroring the PyTorch forward (method='half')."""
    kernel_np = create_kernel(radius=1.0, circular=True, distance_weighted=True,
                              hole=True, method=3, sigma=2.0, normalised=False)
    pad = (kernel_np.shape[0] - 1) // 2
    strength = kernel_np.size / (kernel_np.size - 1.0)
    C = len(classes)
    cls = jnp.asarray(classes, jnp.float32).reshape(1, C, 1, 1)
    t = target.astype(jnp.float32)
    squeeze = (t.ndim == 2)
    if squeeze:
        t = t[None]
    th = (t[:, None, :, :] == cls).astype(jnp.float32)             # [B,C,H,W]
    thp = jnp.pad(th, ((0, 0), (0, 0), (pad, pad), (pad, pad)), mode="edge")
    w = jnp.tile(jnp.asarray(kernel_np)[None, None], (C, 1, 1, 1))  # [C,1,k,k]
    conv = jax.lax.conv_general_dilated(
        thp, w, window_strides=(1, 1), padding=[(pad, pad), (pad, pad)],
        feature_group_count=C, dimension_numbers=("NCHW", "OIHW", "NCHW"))
    conv = jnp.where(thp == 1.0, float(kernel_np.sum() * strength), conv)
    conv = conv[:, :, pad:-pad, pad:-pad]
    denom = jnp.maximum(conv.sum(1, keepdims=True), epsilon)
    out = conv / denom
    return out[0] if squeeze else out


if __name__ == "__main__":
    key = jax.random.PRNGKey(0)
    classes = [10, 20, 30, 40, 50]
    B, H, W = 2, 16, 16

    idx = jax.random.randint(key, (B, H, W), 0, len(classes))
    target = jnp.asarray(classes, dtype=jnp.int32)[idx]            # [B, H, W] class codes

    out = jax.block_until_ready(spatial_hot(target, classes))
    ref = jax.block_until_ready(_reference(target, classes))

    assert out.shape == (B, len(classes), H, W)
    np.testing.assert_allclose(np.asarray(out), np.asarray(ref), rtol=1e-5, atol=1e-5)

    print("KERNEL_OK")
</pallas_src>

<mosaic_0001>
module attributes {stable_mosaic.version = 11 : i64} {
  func.func @_spatial_hot_kernel(%arg0: i32, %arg1: i32, %arg2: memref<1x5x2x128xi32, #tpu.memory_space<vmem>>, %arg3: memref<1x5x2x128xf32, #tpu.memory_space<vmem>>) attributes {dimension_semantics = [#tpu.dimension_semantics<parallel>, #tpu.dimension_semantics<parallel>], iteration_bounds = array<i64: 2, 1>, scalar_prefetch = 0 : i64, scratch_operands = 0 : i64, tpu.core_type = #tpu.core_type<tc>, window_params = [{transform_indices = @transform_0, window_bounds = array<i64: 1, 5, 2, 128>}, {transform_indices = @transform_1, window_bounds = array<i64: 1, 5, 2, 128>}]} {
    %c0 = arith.constant 0 : index
    %c0_0 = arith.constant 0 : index
    %c0_1 = arith.constant 0 : index
    %c0_2 = arith.constant 0 : index
    %0 = vector.load %arg2[%c0, %c0_0, %c0_1, %c0_2] : memref<1x5x2x128xi32, #tpu.memory_space<vmem>>, vector<1x1x2x128xi32>
    %1 = vector.shape_cast %0 : vector<1x1x2x128xi32> to vector<2x128xi32>
    %c0_3 = arith.constant 0 : index
    %c1 = arith.constant 1 : index
    %c0_4 = arith.constant 0 : index
    %c0_5 = arith.constant 0 : index
    %2 = vector.load %arg2[%c0_3, %c1, %c0_4, %c0_5] : memref<1x5x2x128xi32, #tpu.memory_space<vmem>>, vector<1x1x2x128xi32>
    %3 = vector.shape_cast %2 : vector<1x1x2x128xi32> to vector<2x128xi32>
    %c0_6 = arith.constant 0 : index
    %c2 = arith.constant 2 : index
    %c0_7 = arith.constant 0 : index
    %c0_8 = arith.constant 0 : index
    %4 = vector.load %arg2[%c0_6, %c2, %c0_7, %c0_8] : memref<1x5x2x128xi32, #tpu.memory_space<vmem>>, vector<1x1x2x128xi32>
    %5 = vector.shape_cast %4 : vector<1x1x2x128xi32> to vector<2x128xi32>
    %c0_9 = arith.constant 0 : index
    %c3 = arith.constant 3 : index
    %c0_10 = arith.constant 0 : index
    %c0_11 = arith.constant 0 : index
    %6 = vector.load %arg2[%c0_9, %c3, %c0_10, %c0_11] : memref<1x5x2x128xi32, #tpu.memory_space<vmem>>, vector<1x1x2x128xi32>
    %7 = vector.shape_cast %6 : vector<1x1x2x128xi32> to vector<2x128xi32>
    %c0_12 = arith.constant 0 : index
    %c4 = arith.constant 4 : index
    %c0_13 = arith.constant 0 : index
    %c0_14 = arith.constant 0 : index
    %8 = vector.load %arg2[%c0_12, %c4, %c0_13, %c0_14] : memref<1x5x2x128xi32, #tpu.memory_space<vmem>>, vector<1x1x2x128xi32>
    %9 = vector.shape_cast %8 : vector<1x1x2x128xi32> to vector<2x128xi32>
    %c10_i32 = arith.constant 10 : i32
    %10 = vector.broadcast %c10_i32 : i32 to vector<2x128xi32>
    %11 = arith.cmpi eq, %3, %10 : vector<2x128xi32>
    %12 = arith.extui %11 : vector<2x128xi1> to vector<2x128xi32>
    %13 = arith.sitofp %12 : vector<2x128xi32> to vector<2x128xf32>
    %c10_i32_15 = arith.constant 10 : i32
    %14 = vector.broadcast %c10_i32_15 : i32 to vector<2x128xi32>
    %15 = arith.cmpi eq, %5, %14 : vector<2x128xi32>
    %16 = arith.extui %15 : vector<2x128xi1> to vector<2x128xi32>
    %17 = arith.sitofp %16 : vector<2x128xi32> to vector<2x128xf32>
    %18 = arith.addf %13, %17 : vector<2x128xf32>
    %c10_i32_16 = arith.constant 10 : i32
    %19 = vector.broadcast %c10_i32_16 : i32 to vector<2x128xi32>
    %20 = arith.cmpi eq, %7, %19 : vector<2x128xi32>
    %21 = arith.extui %20 : vector<2x128xi1> to vector<2x128xi32>
    %22 = arith.sitofp %21 : vector<2x128xi32> to vector<2x128xf32>
    %23 = arith.addf %18, %22 : vector<2x128xf32>
    %c10_i32_17 = arith.constant 10 : i32
    %24 = vector.broadcast %c10_i32_17 : i32 to vector<2x128xi32>
    %25 = arith.cmpi eq, %9, %24 : vector<2x128xi32>
    %26 = arith.extui %25 : vector<2x128xi1> to vector<2x128xi32>
    %27 = arith.sitofp %26 : vector<2x128xi32> to vector<2x128xf32>
    %28 = arith.addf %23, %27 : vector<2x128xf32>
    %cst = arith.constant 0.882496893 : f32
    %29 = vector.broadcast %cst : f32 to vector<2x128xf32>
    %30 = arith.mulf %29, %28 : vector<2x128xf32>
    %c10_i32_18 = arith.constant 10 : i32
    %31 = vector.broadcast %c10_i32_18 : i32 to vector<2x128xi32>
    %32 = arith.cmpi eq, %1, %31 : vector<2x128xi32>
    %cst_19 = arith.constant 3.97123599 : f32
    %33 = vector.broadcast %cst_19 : f32 to vector<2x128xf32>
    %34 = arith.select %32, %33, %30 : vector<2x128xi1>, vector<2x128xf32>
    %c20_i32 = arith.constant 20 : i32
    %35 = vector.broadcast %c20_i32 : i32 to vector<2x128xi32>
    %36 = arith.cmpi eq, %3, %35 : vector<2x128xi32>
    %37 = arith.extui %36 : vector<2x128xi1> to vector<2x128xi32>
    %38 = arith.sitofp %37 : vector<2x128xi32> to vector<2x128xf32>
    %c20_i32_20 = arith.constant 20 : i32
    %39 = vector.broadcast %c20_i32_20 : i32 to vector<2x128xi32>
    %40 = arith.cmpi eq, %5, %39 : vector<2x128xi32>
    %41 = arith.extui %40 : vector<2x128xi1> to vector<2x128xi32>
    %42 = arith.sitofp %41 : vector<2x128xi32> to vector<2x128xf32>
    %43 = arith.addf %38, %42 : vector<2x128xf32>
    %c20_i32_21 = arith.constant 20 : i32
    %44 = vector.broadcast %c20_i32_21 : i32 to vector<2x128xi32>
    %45 = arith.cmpi eq, %7, %44 : vector<2x128xi32>
    %46 = arith.extui %45 : vector<2x128xi1> to vector<2x128xi32>
    %47 = arith.sitofp %46 : vector<2x128xi32> to vector<2x128xf32>
    %48 = arith.addf %43, %47 : vector<2x128xf32>
    %c20_i32_22 = arith.constant 20 : i32
    %49 = vector.broadcast %c20_i32_22 : i32 to vector<2x128xi32>
    %50 = arith.cmpi eq, %9, %49 : vector<2x128xi32>
    %51 = arith.extui %50 : vector<2x128xi1> to vector<2x128xi32>
    %52 = arith.sitofp %51 : vector<2x128xi32> to vector<2x128xf32>
    %53 = arith.addf %48, %52 : vector<2x128xf32>
    %cst_23 = arith.constant 0.882496893 : f32
    %54 = vector.broadcast %cst_23 : f32 to vector<2x128xf32>
    %55 = arith.mulf %54, %53 : vector<2x128xf32>
    %c20_i32_24 = arith.constant 20 : i32
    %56 = vector.broadcast %c20_i32_24 : i32 to vector<2x128xi32>
    %57 = arith.cmpi eq, %1, %56 : vector<2x128xi32>
    %cst_25 = arith.constant 3.97123599 : f32
    %58 = vector.broadcast %cst_25 : f32 to vector<2x128xf32>
    %59 = arith.select %57, %58, %55 : vector<2x128xi1>, vector<2x128xf32>
    %60 = arith.addf %34, %59 : vector<2x128xf32>
    %c30_i32 = arith.constant 30 : i32
    %61 = vector.broadcast %c30_i32 : i32 to vector<2x128xi32>
    %62 = arith.cmpi eq, %3, %61 : vector<2x128xi32>
    %63 = arith.extui %62 : vector<2x128xi1> to vector<2x128xi32>
    %64 = arith.sitofp %63 : vector<2x128xi32> to vector<2x128xf32>
    %c30_i32_26 = arith.constant 30 : i32
    %65 = vector.broadcast %c30_i32_26 : i32 to vector<2x128xi32>
    %66 = arith.cmpi eq, %5, %65 : vector<2x128xi32>
    %67 = arith.extui %66 : vector<2x128xi1> to vector<2x128xi32>
    %68 = arith.sitofp %67 : vector<2x128xi32> to vector<2x128xf32>
    %69 = arith.addf %64, %68 : vector<2x128xf32>
    %c30_i32_27 = arith.constant 30 : i32
    %70 = vector.broadcast %c30_i32_27 : i32 to vector<2x128xi32>
    %71 = arith.cmpi eq, %7, %70 : vector<2x128xi32>
    %72 = arith.extui %71 : vector<2x128xi1> to vector<2x128xi32>
    %73 = arith.sitofp %72 : vector<2x128xi32> to vector<2x128xf32>
    %74 = arith.addf %69, %73 : vector<2x128xf32>
    %c30_i32_28 = arith.constant 30 : i32
    %75 = vector.broadcast %c30_i32_28 : i32 to vector<2x128xi32>
    %76 = arith.cmpi eq, %9, %75 : vector<2x128xi32>
    %77 = arith.extui %76 : vector<2x128xi1> to vector<2x128xi32>
    %78 = arith.sitofp %77 : vector<2x128xi32> to vector<2x128xf32>
    %79 = arith.addf %74, %78 : vector<2x128xf32>
    %cst_29 = arith.constant 0.882496893 : f32
    %80 = vector.broadcast %cst_29 : f32 to vector<2x128xf32>
    %81 = arith.mulf %80, %79 : vector<2x128xf32>
    %c30_i32_30 = arith.constant 30 : i32
    %82 = vector.broadcast %c30_i32_30 : i32 to vector<2x128xi32>
    %83 = arith.cmpi eq, %1, %82 : vector<2x128xi32>
    %cst_31 = arith.constant 3.97123599 : f32
    %84 = vector.broadcast %cst_31 : f32 to vector<2x128xf32>
    %85 = arith.select %83, %84, %81 : vector<2x128xi1>, vector<2x128xf32>
    %86 = arith.addf %60, %85 : vector<2x128xf32>
    %c40_i32 = arith.constant 40 : i32
    %87 = vector.broadcast %c40_i32 : i32 to vector<2x128xi32>
    %88 = arith.cmpi eq, %3, %87 : vector<2x128xi32>
    %89 = arith.extui %88 : vector<2x128xi1> to vector<2x128xi32>
    %90 = arith.sitofp %89 : vector<2x128xi32> to vector<2x128xf32>
    %c40_i32_32 = arith.constant 40 : i32
    %91 = vector.broadcast %c40_i32_32 : i32 to vector<2x128xi32>
    %92 = arith.cmpi eq, %5, %91 : vector<2x128xi32>
    %93 = arith.extui %92 : vector<2x128xi1> to vector<2x128xi32>
    %94 = arith.sitofp %93 : vector<2x128xi32> to vector<2x128xf32>
    %95 = arith.addf %90, %94 : vector<2x128xf32>
    %c40_i32_33 = arith.constant 40 : i32
    %96 = vector.broadcast %c40_i32_33 : i32 to vector<2x128xi32>
    %97 = arith.cmpi eq, %7, %96 : vector<2x128xi32>
    %98 = arith.extui %97 : vector<2x128xi1> to vector<2x128xi32>
    %99 = arith.sitofp %98 : vector<2x128xi32> to vector<2x128xf32>
    %100 = arith.addf %95, %99 : vector<2x128xf32>
    %c40_i32_34 = arith.constant 40 : i32
    %101 = vector.broadcast %c40_i32_34 : i32 to vector<2x128xi32>
    %102 = arith.cmpi eq, %9, %101 : vector<2x128xi32>
    %103 = arith.extui %102 : vector<2x128xi1> to vector<2x128xi32>
    %104 = arith.sitofp %103 : vector<2x128xi32> to vector<2x128xf32>
    %105 = arith.addf %100, %104 : vector<2x128xf32>
    %cst_35 = arith.constant 0.882496893 : f32
    %106 = vector.broadcast %cst_35 : f32 to vector<2x128xf32>
    %107 = arith.mulf %106, %105 : vector<2x128xf32>
    %c40_i32_36 = arith.constant 40 : i32
    %108 = vector.broadcast %c40_i32_36 : i32 to vector<2x128xi32>
    %109 = arith.cmpi eq, %1, %108 : vector<2x128xi32>
    %cst_37 = arith.constant 3.97123599 : f32
    %110 = vector.broadcast %cst_37 : f32 to vector<2x128xf32>
    %111 = arith.select %109, %110, %107 : vector<2x128xi1>, vector<2x128xf32>
    %112 = arith.addf %86, %111 : vector<2x128xf32>
    %c50_i32 = arith.constant 50 : i32
    %113 = vector.broadcast %c50_i32 : i32 to vector<2x128xi32>
    %114 = arith.cmpi eq, %3, %113 : vector<2x128xi32>
    %115 = arith.extui %114 : vector<2x128xi1> to vector<2x128xi32>
    %116 = arith.sitofp %115 : vector<2x128xi32> to vector<2x128xf32>
    %c50_i32_38 = arith.constant 50 : i32
    %117 = vector.broadcast %c50_i32_38 : i32 to vector<2x128xi32>
    %118 = arith.cmpi eq, %5, %117 : vector<2x128xi32>
    %119 = arith.extui %118 : vector<2x128xi1> to vector<2x128xi32>
    %120 = arith.sitofp %119 : vector<2x128xi32> to vector<2x128xf32>
    %121 = arith.addf %116, %120 : vector<2x128xf32>
    %c50_i32_39 = arith.constant 50 : i32
    %122 = vector.broadcast %c50_i32_39 : i32 to vector<2x128xi32>
    %123 = arith.cmpi eq, %7, %122 : vector<2x128xi32>
    %124 = arith.extui %123 : vector<2x128xi1> to vector<2x128xi32>
    %125 = arith.sitofp %124 : vector<2x128xi32> to vector<2x128xf32>
    %126 = arith.addf %121, %125 : vector<2x128xf32>
    %c50_i32_40 = arith.constant 50 : i32
    %127 = vector.broadcast %c50_i32_40 : i32 to vector<2x128xi32>
    %128 = arith.cmpi eq, %9, %127 : vector<2x128xi32>
    %129 = arith.extui %128 : vector<2x128xi1> to vector<2x128xi32>
    %130 = arith.sitofp %129 : vector<2x128xi32> to vector<2x128xf32>
    %131 = arith.addf %126, %130 : vector<2x128xf32>
    %cst_41 = arith.constant 0.882496893 : f32
    %132 = vector.broadcast %cst_41 : f32 to vector<2x128xf32>
    %133 = arith.mulf %132, %131 : vector<2x128xf32>
    %c50_i32_42 = arith.constant 50 : i32
    %134 = vector.broadcast %c50_i32_42 : i32 to vector<2x128xi32>
    %135 = arith.cmpi eq, %1, %134 : vector<2x128xi32>
    %cst_43 = arith.constant 3.97123599 : f32
    %136 = vector.broadcast %cst_43 : f32 to vector<2x128xf32>
    %137 = arith.select %135, %136, %133 : vector<2x128xi1>, vector<2x128xf32>
    %138 = arith.addf %112, %137 : vector<2x128xf32>
    %cst_44 = arith.constant 1.000000e-07 : f32
    %139 = vector.broadcast %cst_44 : f32 to vector<2x128xf32>
    %140 = arith.maximumf %138, %139 : vector<2x128xf32>
    %141 = tpu.reciprocal %140 : vector<2x128xf32> -> vector<2x128xf32>
    %142 = arith.mulf %34, %141 : vector<2x128xf32>
    %c0_45 = arith.constant 0 : index
    %c0_46 = arith.constant 0 : index
    %c0_47 = arith.constant 0 : index
    %c0_48 = arith.constant 0 : index
    %143 = vector.load %arg3[%c0_45, %c0_46, %c0_47, %c0_48] : memref<1x5x2x128xf32, #tpu.memory_space<vmem>>, vector<1x1x2x128xf32>
    %144 = vector.shape_cast %143 : vector<1x1x2x128xf32> to vector<2x128xf32>
    %145 = vector.shape_cast %142 : vector<2x128xf32> to vector<1x1x2x128xf32>
    tpu.vector_store %arg3[%c0_45, %c0_46, %c0_47, %c0_48], %145 {strides = array<i32>} : memref<1x5x2x128xf32, #tpu.memory_space<vmem>>, vector<1x1x2x128xf32>,
    %146 = arith.mulf %59, %141 : vector<2x128xf32>
    %c0_49 = arith.constant 0 : index
    %c1_50 = arith.constant 1 : index
    %c0_51 = arith.constant 0 : index
    %c0_52 = arith.constant 0 : index
    %147 = vector.load %arg3[%c0_49, %c1_50, %c0_51, %c0_52] : memref<1x5x2x128xf32, #tpu.memory_space<vmem>>, vector<1x1x2x128xf32>
    %148 = vector.shape_cast %147 : vector<1x1x2x128xf32> to vector<2x128xf32>
    %149 = vector.shape_cast %146 : vector<2x128xf32> to vector<1x1x2x128xf32>
    tpu.vector_store %arg3[%c0_49, %c1_50, %c0_51, %c0_52], %149 {strides = array<i32>} : memref<1x5x2x128xf32, #tpu.memory_space<vmem>>, vector<1x1x2x128xf32>,
    %150 = arith.mulf %85, %141 : vector<2x128xf32>
    %c0_53 = arith.constant 0 : index
    %c2_54 = arith.constant 2 : index
    %c0_55 = arith.constant 0 : index
    %c0_56 = arith.constant 0 : index
    %151 = vector.load %arg3[%c0_53, %c2_54, %c0_55, %c0_56] : memref<1x5x2x128xf32, #tpu.memory_space<vmem>>, vector<1x1x2x128xf32>
    %152 = vector.shape_cast %151 : vector<1x1x2x128xf32> to vector<2x128xf32>
    %153 = vector.shape_cast %150 : vector<2x128xf32> to vector<1x1x2x128xf32>
    tpu.vector_store %arg3[%c0_53, %c2_54, %c0_55, %c0_56], %153 {strides = array<i32>} : memref<1x5x2x128xf32, #tpu.memory_space<vmem>>, vector<1x1x2x128xf32>,
    %154 = arith.mulf %111, %141 : vector<2x128xf32>
    %c0_57 = arith.constant 0 : index
    %c3_58 = arith.constant 3 : index
    %c0_59 = arith.constant 0 : index
    %c0_60 = arith.constant 0 : index
    %155 = vector.load %arg3[%c0_57, %c3_58, %c0_59, %c0_60] : memref<1x5x2x128xf32, #tpu.memory_space<vmem>>, vector<1x1x2x128xf32>
    %156 = vector.shape_cast %155 : vector<1x1x2x128xf32> to vector<2x128xf32>
    %157 = vector.shape_cast %154 : vector<2x128xf32> to vector<1x1x2x128xf32>
    tpu.vector_store %arg3[%c0_57, %c3_58, %c0_59, %c0_60], %157 {strides = array<i32>} : memref<1x5x2x128xf32, #tpu.memory_space<vmem>>, vector<1x1x2x128xf32>,
    %158 = arith.mulf %137, %141 : vector<2x128xf32>
    %c0_61 = arith.constant 0 : index
    %c4_62 = arith.constant 4 : index
    %c0_63 = arith.constant 0 : index
    %c0_64 = arith.constant 0 : index
    %159 = vector.load %arg3[%c0_61, %c4_62, %c0_63, %c0_64] : memref<1x5x2x128xf32, #tpu.memory_space<vmem>>, vector<1x1x2x128xf32>
    %160 = vector.shape_cast %159 : vector<1x1x2x128xf32> to vector<2x128xf32>
    %161 = vector.shape_cast %158 : vector<2x128xf32> to vector<1x1x2x128xf32>
    tpu.vector_store %arg3[%c0_61, %c4_62, %c0_63, %c0_64], %161 {strides = array<i32>} : memref<1x5x2x128xf32, #tpu.memory_space<vmem>>, vector<1x1x2x128xf32>,
    return
  }
  func.func @transform_0(%arg0: i32, %arg1: i32) -> (i32, i32, i32, i32) {
    %c0_i32 = arith.constant 0 : i32
    %c0_i32_0 = arith.constant 0 : i32
    %c0_i32_1 = arith.constant 0 : i32
    return %arg0, %c0_i32, %arg1, %c0_i32_0 : i32, i32, i32, i32
  }
  func.func @transform_1(%arg0: i32, %arg1: i32) -> (i32, i32, i32, i32) {
    %c0_i32 = arith.constant 0 : i32
    %c0_i32_0 = arith.constant 0 : i32
    %c0_i32_1 = arith.constant 0 : i32
    return %arg0, %c0_i32, %arg1, %c0_i32_0 : i32, i32, i32, i32
  }
}

</mosaic_0001>

<bundles_post_ra>
// kernel: tpu_custom_call.1
= control target key start
LH: loop header
LB: loop body
LE: loop exit
PB: predicated region body
PF: predicated region fallthrough
CT: control target
= control target key end

     0   :  { %6 = vsyncpa [#allocation3], 0  ;;  %s836_s0 = inlined_call_operand.hbm [shape: s32[2,5,2,128], index: 0, kind: input, shape index: {}]   ;;  %s837_s1 = inlined_call_operand.hbm [shape: f32[2,5,2,128], index: 1, kind: output, shape index: {}]  }
   0x1   :  { %8 = vsyncpa [#allocation3 + $0x1], 0 }
   0x2   :  { %9 = vsyncpa [#allocation4], 0 }
   0x3   :  { %11 = vsyncpa [#allocation4 + $0x1], 0  ;;  %s612_s6 = smov 0   ;;  %s614_s7 = smov 0  }
   0x4   :  { %s616_s8 = smov 0   ;;  %s618_s9 = smov 0  }
   0x5   :  { %s620_s10 = smov 0   ;;  %s622_s11 = smov 0  }
   0x6 LB: > { %s371_s12 = sadd.s32 4294967295, %s593_s11   ;;  %s372_s13 = sadd.s32 4294967294, %s593_s11   ;;  %s593_s11 = sphi %s622_s11, %s17_s11   ;;  %s589_s10 = sphi %s620_s10, %s852_s10   ;;  %s585_s9 = sphi %s618_s9, %s851_s9   ;;  %s581_s8 = sphi %s616_s8, %s850_s8   ;;  %s577_s7 = sphi %s614_s7, %s849_s7   ;;  %s573_s6 = sphi %s612_s6, %s848_s6  }
   0x7   : > { %s29_s14 = sadd.s32 1, %s589_s10  ;;  %s38_s15 = sadd.s32 1, %s581_s8 }
   0x8   : > { %p31_p0 = scmp.ge.s32.totalorder %s29_s14, 2  ;;  %p45_p1 = scmp.ne.s32.totalorder %s581_s8, %s577_s7 }
   0x9   : > { %p46_p2 = scmp.eq.s32.totalorder %s593_s11, 0  ;;  %p51_p3 = scmp.ne.s32.totalorder %s577_s7, %s573_s6 }
   0xa   : > { %s854_s14 = smov (%p31_p0, %s29_s14), 0  ;;  %p52_p5 = scmp.eq.s32.totalorder %s371_s12, 0 }
   0xb   : > { %p653_p4 = por %p46_p2, %p45_p1  ;;  %s33_s17 = ssub.s32 %s589_s10, %s854_s14 }
   0xc   : > { %p77_p6 = scmp.eq.s32.totalorder %s371_s12, 1  ;;  %p36_p7 = scmp.eq.s32.totalorder %s33_s17, 0 }
   0xd   : > { %p659_p8 = por %p52_p5, %p51_p3  ;;  %p83_p10 = scmp.eq.s32.totalorder %s372_s13, 1 }
   0xe   : > { %p663_p9 = por %p77_p6, %p45_p1  ;;  %p424_p13 = scmp.lt.s32.totalorder %s593_s11, 2 }
   0xf   : > { %s668_s20 = scalar_select %p36_p7, %s581_s8, %s38_s15  }
  0x10   : > { %s841_s19 = scalar_select %p663_p9, 1, 0 }
  0x11   : > { %p670_p11 = por %p83_p10, %p51_p3  ;;  %s103_s22 = sand.u32 1, %s581_s8  }
  0x12   : > { %s408_s23 = smul.u32 10, %s103_s22  ;;  %p680_p0 = pnand %p424_p13, %p653_p4 }
  0x13   : > { %s842_s21 = scalar_select %p670_p11, 1, 0 }
  0x14   : > { %s409_s24 = smul.u32 160, %s589_s10  ;;  %s107_s29 = scalar_lea.vmem [#allocation2], %s408_s23 }
  0x15   : > { %s115_s30 = sshll.u32 %s107_s29, 4  ;;  %s692_s2 = scalar_lea.sflag [#allocation3], %s103_s22  ;;  %s689_s30 = int_to_ptr.vmem [resolvable:$true] %s115_s30 }
  0x16   : > { %s687_s28 = scalar_lea.hbm %s836_s0, %s409_s24  ;;  %p483_p3 = pneg %p680_p0 }
  0x17   : > { %s481_s3 = scalar_lea.hbm %s687_s28, 160  ;;  %s486_s12 = scalar_lea.hbm %s836_s0, 320 }
  0x18   : > { %p482_p2 = scmp.ne.s32.totalorder %s687_s28, %s481_s3  ;;  %p487_p6 = scmp.lt.u32.totalorder %s687_s28, %s836_s0 }
  0x19   : > { %p488_p7 = scmp.lt.u32.totalorder %s486_s12, %s481_s3  ;;  %p490_p13 = scmp.lt.u32.totalorder %s481_s3, %s687_s28 }
  0x1a   : > { %p484_p4 = pnand %p483_p3, %p482_p2 }
  0x1b   : > { %p489_p10 = por %p488_p7, %p487_p6 }
  0x1c   : > { %p485_p5 = pneg %p484_p4 }
  0x1d   : > { %p491_p12 = por %p490_p13, %p489_p10 }
  0x1f   : > { %p492_p1 = pnand %p491_p12, %p485_p5 }
  0x21   : > { %495 = shalt.err (!%p492_p1)
}
  0x22   : > { %s496_s16 = scalar_lea.vmem %s689_s30, 160  ;;  %s595_s17 = smov [#allocation2]  }
  0x23   : > { %p497_p2 = scmp.ne.s32.totalorder %s689_s30, %s496_s16  ;;  %s501_s22 = sshll.u32 %s595_s17, 4  ;;  %s502_s22 = int_to_ptr.vmem [resolvable:$false] %s501_s22 }
  0x24   : > { %s503_s23 = scalar_lea.vmem %s502_s22, 320  ;;  %p504_p9 = scmp.lt.s32.totalorder %s689_s30, %s502_s22 }
  0x25   : > { %p499_p4 = pnand %p497_p2, %p483_p3  ;;  %p505_p6 = scmp.lt.s32.totalorder %s503_s23, %s496_s16 }
  0x27   : > { %p500_p11 = pneg %p499_p4  ;;  %p506_p7 = por %p505_p6, %p504_p9 }
  0x29   : > { %p507_p10 = pnand %p506_p7, %p500_p11 }
  0x2b   : > { %510 = shalt.err (!%p507_p10)
}
  0x2c   : > { %s596_s24 = smov 32   ;;  %s597_s26 = smov 2  }
  0x2d   : > { %419 = dma.hbm_to_vmem [thread:$0]  (!%p680_p0), %s687_s28, 160, %s689_s30, %s692_s2, %s596_s24, %s596_s24, %s597_s26  }
  0x2e   : > { %p123_p12 = scmp.lt.s32.totalorder %s593_s11, 3  ;;  %p844_p1 = scmp.ge.s32.totalorder %s593_s11, 1 }
  0x30   : > { %p124_p3 = pnand %p844_p1, %p123_p12 }
  0x31   : > { %s724_s27 = sand.u32 (!%p124_p3), 1, %s577_s7  }
  0x32   : > { %127 = sbr.rel (%p124_p3) target bundleno = 116 (0x74), region = 24  ;;  %s130_s3 = scalar_lea.sflag (!%p124_p3), [#allocation3], %s724_s27 }
  0x33   : > { %s410_s29 = smul.u32 (!%p124_p3), 10, %s724_s27 }
  0x35   : > { %s133_s4 = scalar_lea.vmem (!%p124_p3), [#allocation2], %s410_s29 }
  0x39   : > { %564 = dma.done.wait (%p659_p8), %s130_s3, 160  }
  0x3a   : > { %566 = vsyncadd (%p659_p8), %s130_s3, 4294967136  ;;  %v377_v0 = vld [vmem:[%s133_s4 + $0x2] sm:$0x3]  ;;  %v378_v1 = vld [vmem:[%s133_s4 + $0x4] sm:$0x3]  ;;  %v598_v4 = vmov 0.0  }
  0x3b   : > { %v734_v2 = vld [vmem:[%s133_s4 + $0x6] sm:$0x3]  ;;  %v736_v3 = vld [vmem:[%s133_s4 + $0x8] sm:$0x3]  ;;  %vm161_vm0 = vcmp.eq.s32.totalorder %v377_v0, 10  ;;  %vm164_vm1 = vcmp.eq.s32.totalorder %v378_v1, 10 }
  0x3c   : > { %v381_v5 = vsel %vm161_vm0, 1.0, %v598_v4  ;;  %v382_v6 = vsel %vm164_vm1, 1.0, %v598_v4  ;;  %vm168_vm2 = vcmp.eq.s32.totalorder %v734_v2, 10  ;;  %vm172_vm3 = vcmp.eq.s32.totalorder %v736_v3, 10  ;;  %v742_v7 = vld [vmem:[%s133_s4] sm:$0x3] }
  0x3d   : > { %v167_v8 = vadd.f32 %v382_v6, %v381_v5  ;;  %v383_v9 = vsel %vm168_vm2, 1.0, %v598_v4  ;;  %v384_v10 = vsel %vm172_vm3, 1.0, %v598_v4  ;;  %vm179_vm4 = vcmp.eq.s32.totalorder %v377_v0, 20  ;;  %s151_s18 = scalar_lea.vmem [#allocation5], %s410_s29  ;;  %s411_s28 = smul.u32 160, %s585_s9 }
  0x3e   : > { %vm182_vm5 = vcmp.eq.s32.totalorder %v378_v1, 20  ;;  %vm186_vm6 = vcmp.eq.s32.totalorder %v734_v2, 20  ;;  %vm190_vm7 = vcmp.eq.s32.totalorder %v736_v3, 20  ;;  %v385_v12 = vsel %vm179_vm4, 1.0, %v598_v4  ;;  %s286_s25 = sshll.u32 %s151_s18, 4  ;;  %s272_s9 = scalar_lea.sflag [#allocation4], %s724_s27  ;;  %s782_s25 = int_to_ptr.vmem [resolvable:$true] %s286_s25 }
  0x3f   : > { %v171_v11 = vadd.f32 %v383_v9, %v167_v8  ;;  %v386_v13 = vsel %vm182_vm5, 1.0, %v598_v4  ;;  %v387_v14 = vsel %vm186_vm6, 1.0, %v598_v4  ;;  %vm177_vm8 = vcmp.eq.s32.totalorder %v742_v7, 10  ;;  %s787_s5 = scalar_lea.hbm %s837_s1, %s411_s28  ;;  %s511_s12 = scalar_lea.vmem %s782_s25, 160 }
  0x40   : > { %v185_v15 = vadd.f32 %v386_v13, %v385_v12  ;;  %v388_v16 = vsel %vm190_vm7, 1.0, %v598_v4  ;;  %vm198_vm9 = vcmp.eq.s32.totalorder %v377_v0, 30  ;;  %vm201_vm10 = vcmp.eq.s32.totalorder %v378_v1, 30  ;;  %p512_p8 = scmp.ne.s32.totalorder %s782_s25, %s511_s12  ;;  %p845_p9 = scmp.ne.s32.totalorder %s841_s19, 0 }
  0x41   : > { %v175_v17 = vadd.f32 %v384_v10, %v171_v11  ;;  %v389_v18 = vsel %vm198_vm9, 1.0, %v598_v4  ;;  %vm205_vm11 = vcmp.eq.s32.totalorder %v734_v2, 30  ;;  %v390_v20 = vsel %vm201_vm10, 1.0, %v598_v4  ;;  %s599_s13 = smov [#allocation5]  }
  0x42   : > { %v189_v19 = vadd.f32 %v387_v14, %v185_v15  ;;  %v391_v21 = vsel %vm205_vm11, 1.0, %v598_v4  ;;  %vm209_vm12 = vcmp.eq.s32.totalorder %v736_v3, 30  ;;  %vm195_vm13 = vcmp.eq.s32.totalorder %v742_v7, 20  ;;  %p513_p11 = pnand %p512_p8, %p845_p9  ;;  %s515_s15 = sshll.u32 %s599_s13, 4  ;;  %s516_s15 = int_to_ptr.vmem [resolvable:$false] %s515_s15 }
  0x43   : > { %v176_v22 = vmul.f32 0.8824969, %v175_v17  ;;  %v204_v23 = vadd.f32 %v390_v20, %v389_v18  ;;  %v392_v24 = vsel %vm209_vm12, 1.0, %v598_v4  ;;  %vm217_vm14 = vcmp.eq.s32.totalorder %v377_v0, 40  ;;  %s517_s16 = scalar_lea.vmem %s516_s15, 320  ;;  %p518_p5 = scmp.lt.s32.totalorder %s782_s25, %s516_s15 }
  0x44   : > { %v193_v25 = vadd.f32 %v388_v16, %v189_v19  ;;  %vm220_vm15 = vcmp.eq.s32.totalorder %v378_v1, 40  ;;  %vm224_vm0 = vcmp.eq.s32.totalorder %v734_v2, 40  ;;  %v393_v28 = vsel %vm217_vm14, 1.0, %v598_v4  ;;  %p514_p0 = pneg %p513_p11  ;;  %p519_p13 = scmp.lt.s32.totalorder %s517_s16, %s511_s12 }
  0x45   : > { %v178_v26 = vsel %vm177_vm8, 3.971236, %v176_v22  ;;  %v208_v27 = vadd.f32 %v391_v21, %v204_v23  ;;  %v394_v29 = vsel %vm220_vm15, 1.0, %v598_v4  ;;  %v395_v32 = vsel %vm224_vm0, 1.0, %v598_v4 }
  0x46   : > { %v194_v30 = vmul.f32 0.8824969, %v193_v25  ;;  %v223_v31 = vadd.f32 %v394_v29, %v393_v28  ;;  %vm228_vm1 = vcmp.eq.s32.totalorder %v736_v3, 40  ;;  %vm214_vm2 = vcmp.eq.s32.totalorder %v742_v7, 30  ;;  %p520_p2 = por %p519_p13, %p518_p5 }
  0x47   : > { %v212_v33 = vadd.f32 %v392_v24, %v208_v27  ;;  %v396_v34 = vsel %vm228_vm1, 1.0, %v598_v4  ;;  %vm236_vm3 = vcmp.eq.s32.totalorder %v377_v0, 50  ;;  %vm239_vm4 = vcmp.eq.s32.totalorder %v378_v1, 50 }
  0x48   : > { %v196_v35 = vsel %vm195_vm13, 3.971236, %v194_v30  ;;  %v227_v36 = vadd.f32 %v395_v32, %v223_v31  ;;  %v397_v37 = vsel %vm236_vm3, 1.0, %v598_v4  ;;  %v398_v40 = vsel %vm239_vm4, 1.0, %v598_v4  ;;  %p521_p4 = pnand %p520_p2, %p514_p0 }
  0x49   : > { %v197_v38 = vadd.f32 %v196_v35, %v178_v26  ;;  %v213_v39 = vmul.f32 0.8824969, %v212_v33  ;;  %vm243_vm5 = vcmp.eq.s32.totalorder %v734_v2, 50  ;;  %v242_v42 = vadd.f32 %v398_v40, %v397_v37 }
  0x4a   : > { %v231_v41 = vadd.f32 %v396_v34, %v227_v36  ;;  %v399_v43 = vsel %vm243_vm5, 1.0, %v598_v4  ;;  %vm247_vm6 = vcmp.eq.s32.totalorder %v736_v3, 50  ;;  %vm233_vm7 = vcmp.eq.s32.totalorder %v742_v7, 40 }
  0x4b   : > { %v215_v44 = vsel %vm214_vm2, 3.971236, %v213_v39  ;;  %v400_v45 = vsel %vm247_vm6, 1.0, %v598_v4  ;;  %v246_v48 = vadd.f32 %v399_v43, %v242_v42  ;;  %vm252_vm8 = vcmp.eq.s32.totalorder %v742_v7, 50 }
  0x4c   : > { %v216_v46 = vadd.f32 %v215_v44, %v197_v38  ;;  %v232_v47 = vmul.f32 0.8824969, %v231_v41 }
  0x4d   : > { %v250_v50 = vadd.f32 %v400_v45, %v246_v48 }
  0x4e   : > { %v234_v49 = vsel %vm233_vm7, 3.971236, %v232_v47 }
  0x4f   : > { %v235_v51 = vadd.f32 %v234_v49, %v216_v46  ;;  %v251_v52 = vmul.f32 0.8824969, %v250_v50 }
  0x51   : > { %v253_v53 = vsel %vm252_vm8, 3.971236, %v251_v52 }
  0x52   : > { %v254_v54 = vadd.f32 %v253_v53, %v235_v51 }
  0x54   : > { %v255_v55 = vmax.f32 %v254_v54, 1e-07 }
  0x56   : > { %479 = vrcp.f32 %v255_v55 }
  0x60   : > { %v480_v56 = vpop.eup %479 }
  0x61   : > { %v257_v57 = vmul.f32 %v480_v56, %v178_v26  ;;  %v259_v58 = vmul.f32 %v480_v56, %v196_v35  ;;  %v262_v59 = vmul.f32 %v480_v56, %v215_v44  ;;  %v265_v60 = vmul.f32 %v480_v56, %v234_v49 }
  0x62   : > { %v268_v61 = vmul.f32 %v480_v56, %v253_v53 }
  0x63   : > { %258 = vst [vmem:[%s151_s18] sm:$0x3] %v257_v57  ;;  %401 = vst [vmem:[%s151_s18 + $0x2] sm:$0x3] %v259_v58 }
  0x64   : > { %402 = vst [vmem:[%s151_s18 + $0x4] sm:$0x3] %v262_v59  ;;  %403 = vst [vmem:[%s151_s18 + $0x6] sm:$0x3] %v265_v60 }
  0x65   : > { %404 = vst [vmem:[%s151_s18 + $0x8] sm:$0x3] %v268_v61 }
  0x66   : > { %524 = shalt.err (!%p521_p4)
}
  0x67   : > { %s525_s17 = scalar_lea.hbm %s787_s5, 160  ;;  %s529_s24 = scalar_lea.hbm %s837_s1, 320 }
  0x68   : > { %p526_p6 = scmp.ne.s32.totalorder %s787_s5, %s525_s17  ;;  %p530_p12 = scmp.lt.u32.totalorder %s787_s5, %s837_s1 }
  0x69   : > { %p531_p1 = scmp.lt.u32.totalorder %s529_s24, %s525_s17  ;;  %p533_p8 = scmp.lt.u32.totalorder %s525_s17, %s787_s5 }
  0x6a   : > { %p527_p7 = pnand %p526_p6, %p845_p9 }
  0x6b   : > { %p532_p3 = por %p531_p1, %p530_p12 }
  0x6c   : > { %p528_p10 = pneg %p527_p7 }
  0x6d   : > { %p534_p11 = por %p533_p8, %p532_p3 }
  0x6f   : > { %p535_p0 = pnand %p534_p11, %p528_p10 }
  0x71   : > { %538 = shalt.err (!%p535_p0)
}
  0x72   : > { %s600_s3 = smov 32   ;;  %s601_s4 = smov 2  }
  0x73   : > { %414 = dma.vmem_to_hbm [thread:$0]  (%p845_p9), %s782_s25, 160, %s787_s5, %s272_s9, %s600_s3, %s600_s3, %s601_s4  }
  0x74 PF: > { %s301_s18 = sand.u32 1, %s573_s6   ;;  %p846_p5 = scmp.ne.s32.totalorder %s842_s21, 0 }
  0x75   : > { %p847_p13 = scmp.ge.s32.totalorder %s593_s11, 2  ;;  %s302_s28 = scalar_lea.sflag [#allocation4], %s301_s18 }
  0x77   : > { %p421_p2 = pnand %p847_p13, %p846_p5 }
  0x79   : > { %568 = dma.done.wait (!%p421_p2), %s302_s28, 160  }
  0x7a   : > { %570 = vsyncadd (!%p421_p2), %s302_s28, 4294967136  ;;  %s17_s11 = sadd.s32 1, %s593_s11   ;;  %s848_s6 = smov %s577_s7 }
  0x7b   : > { %p14_p4 = scmp.ge.s32.totalorder %s17_s11, 4   ;;  %s849_s7 = smov %s581_s8 }
  0x7c   : > { %s850_s8 = smov %s668_s20  ;;  %s851_s9 = smov %s589_s10 }
  0x7d   : > { %s852_s10 = smov %s854_s14  ;;  %16 = sbr.rel (!%p14_p4) target bundleno = 6 (0x6), region = 77 }
  0x84   :  { %307 = vsyncpa [#allocation3], 1 }
  0x85   :  { %309 = vsyncpa [#allocation3 + $0x1], 1 }
  0x86   :  { %310 = vsyncpa [#allocation4], 1 }
  0x87   :  { %312 = vsyncpa [#allocation4 + $0x1], 1 }

</bundles_post_ra>
